<compile_context>
chip_gen: v5e
topology: v5e:2x2
jax: 0.10.0
libtpu: 0.0.40
codegen_flags: <defaults>
</compile_context>

<pallas_src>
import functools

import jax
import jax.numpy as jnp
from jax.experimental import pallas as pl
from jax.experimental.pallas import tpu as pltpu

K_IN = 28 * 28        # 784 (784 % 8 == 0, full-extent last dim for the x BlockSpec)
N_OUT = 10
N_PAD = 128           # lane-dense padded logits width


def dnn_kernel(x_ref, w1_ref, b1_ref, w2_ref, b2_ref, w3_ref, b3_ref,
               w4_ref, b4_ref, o_ref):
    # All four matmuls + biases + ReLUs fused.  x arrives as f32 straight from HBM;
    # the bf16 cast happens here on the VPU (free slot under the MXU), so the wrapper
    # never writes a second copy of x.  MXU operands bf16, accumulation f32; bias add
    # and ReLU stay f32 on the VPU, then cast back to bf16 for the next MXU pass.
    x = x_ref[...].astype(jnp.bfloat16)
    h = jnp.dot(x, w1_ref[...], preferred_element_type=jnp.float32) + b1_ref[...]
    h = jnp.maximum(h, 0.0).astype(jnp.bfloat16)
    h = jnp.dot(h, w2_ref[...], preferred_element_type=jnp.float32) + b2_ref[...]
    h = jnp.maximum(h, 0.0).astype(jnp.bfloat16)
    h = jnp.dot(h, w3_ref[...], preferred_element_type=jnp.float32) + b3_ref[...]
    h = jnp.maximum(h, 0.0).astype(jnp.bfloat16)
    out = jnp.dot(h, w4_ref[...], preferred_element_type=jnp.float32) + b4_ref[...]
    o_ref[...] = out.astype(o_ref.dtype)       # (block_b, 128) lane-dense store


def _pick_block_b(B):
    """Largest batch tile that still yields >=4 grid steps (>=2 per TC on v7x),
    capped at 512.  block_b is always a multiple of 8 (sublane rule); VMEM use at
    block_b=512 is ~3.5 MiB including double buffers."""
    if B >= 2048:
        return 512
    tile = -(-B // 4)                 # aim for ~4 grid steps
    tile = ((tile + 7) // 8) * 8      # round up to a sublane multiple of 8
    return max(8, min(512, tile))


@functools.partial(jax.jit, static_argnames=("block_b", "out_dtype"))
def dnn_forward(x, params, *, block_b=None, out_dtype=jnp.float32):
    """x: (B, 1, 28, 28) or (B, 784) float32. Returns (B, 10) logits of `out_dtype`."""
    w1, b1, w2, b2, w3, b3, w4, b4 = params
    x2 = x.reshape(-1, K_IN).astype(jnp.float32)   # same as torch .view(-1, 784); no copies
    B = x2.shape[0]
    if block_b is None:
        block_b = _pick_block_b(B)

    # One-time, tiny weight prep: bf16 MXU operands; biases stay f32.
    w1b = w1.astype(jnp.bfloat16)                                          # (784, 128)
    w2b = w2.astype(jnp.bfloat16)
    w3b = w3.astype(jnp.bfloat16)
    # Lane-dense final layer: zero-pad 10 -> 128 output columns.
    w4p = jnp.pad(w4, ((0, 0), (0, N_PAD - N_OUT))).astype(jnp.bfloat16)   # (128, 128)
    b4p = jnp.pad(b4, ((0, 0), (0, N_PAD - N_OUT)))                        # (1, 128) f32

    grid = (pl.cdiv(B, block_b),)   # ragged tail handled by Pallas writeback masking
    # Weights/biases are grid-invariant (constant index_map): fetched once, kept resident.
    full = lambda a: pl.BlockSpec(a.shape, lambda i: (0,) * a.ndim)

    out = pl.pallas_call(
        dnn_kernel,
        out_shape=jax.ShapeDtypeStruct((B, N_PAD), out_dtype),
        grid=grid,
        in_specs=[
            pl.BlockSpec((block_b, K_IN), lambda i: (i, 0)),   # f32 x tile over batch
            full(w1b), full(b1),
            full(w2b), full(b2),
            full(w3b), full(b3),
            full(w4p), full(b4p),
        ],
        out_specs=pl.BlockSpec((block_b, N_PAD), lambda i: (i, 0)),
        compiler_params=pltpu.CompilerParams(
            dimension_semantics=("parallel",)),
    )(x2, w1b, b1, w2b, b2, w3b, b3, w4p, b4p)

    return out[:, :N_OUT]


def init_params(key):
    """Deterministic init matching nn.Linear default: U(-1/sqrt(fan_in), 1/sqrt(fan_in)).
    Weights stored transposed relative to PyTorch: (in_features, out_features)."""
    dims = [(K_IN, 128), (128, 128), (128, 128), (128, N_OUT)]
    params = []
    for (fan_in, fan_out) in dims:
        key, kw, kb = jax.random.split(key, 3)
        bound = 1.0 / jnp.sqrt(jnp.float32(fan_in))
        w = jax.random.uniform(kw, (fan_in, fan_out), jnp.float32, -bound, bound)
        b = jax.random.uniform(kb, (1, fan_out), jnp.float32, -bound, bound)
        params.extend([w, b])
    return tuple(params)


def reference_forward(x, params):
    """Pure-JAX reference mirroring the kernel's numerics (bf16 operands, f32 accumulate)."""
    w1, b1, w2, b2, w3, b3, w4, b4 = params
    w1b, w2b, w3b, w4b = (w.astype(jnp.bfloat16) for w in (w1, w2, w3, w4))
    h = x.reshape(-1, K_IN).astype(jnp.bfloat16)
    h = jnp.maximum(jnp.dot(h, w1b, preferred_element_type=jnp.float32) + b1, 0.0)
    h = jnp.maximum(jnp.dot(h.astype(jnp.bfloat16), w2b,
                            preferred_element_type=jnp.float32) + b2, 0.0)
    h = jnp.maximum(jnp.dot(h.astype(jnp.bfloat16), w3b,
                            preferred_element_type=jnp.float32) + b3, 0.0)
    return jnp.dot(h.astype(jnp.bfloat16), w4b, preferred_element_type=jnp.float32) + b4


if __name__ == "__main__":
    key = jax.random.PRNGKey(0)
    key, kx = jax.random.split(key)
    # MNIST-like batch in NCHW, as the PyTorch module expects.  B=260 is not a multiple
    # of the auto-picked block_b (72), exercising the ragged-tail masked writeback, and
    # the grid is (4,) so both v7x TensorCores get >=2 pipelined steps each.
    B = 260
    x = jax.random.normal(kx, (B, 1, 28, 28), jnp.float32)
    params = init_params(key)

    out = dnn_forward(x, params)
    out = jax.block_until_ready(out)

    ref = reference_forward(x, params)
    assert out.shape == (B, N_OUT), out.shape
    assert jnp.allclose(out, ref, atol=1e-3, rtol=1e-3), "mismatch vs pure-JAX reference"

    print("KERNEL_OK")
</pallas_src>

<mosaic_0001>
module attributes {stable_mosaic.version = 11 : i64} {
  func.func @dnn_kernel(%arg0: i32, %arg1: memref<72x784xf32, #tpu.memory_space<vmem>>, %arg2: memref<784x128xbf16, #tpu.memory_space<vmem>>, %arg3: memref<1x128xf32, #tpu.memory_space<vmem>>, %arg4: memref<128x128xbf16, #tpu.memory_space<vmem>>, %arg5: memref<1x128xf32, #tpu.memory_space<vmem>>, %arg6: memref<128x128xbf16, #tpu.memory_space<vmem>>, %arg7: memref<1x128xf32, #tpu.memory_space<vmem>>, %arg8: memref<128x128xbf16, #tpu.memory_space<vmem>>, %arg9: memref<1x128xf32, #tpu.memory_space<vmem>>, %arg10: memref<72x128xf32, #tpu.memory_space<vmem>>) attributes {dimension_semantics = [#tpu.dimension_semantics<parallel>], iteration_bounds = array<i64: 4>, scalar_prefetch = 0 : i64, scratch_operands = 0 : i64, tpu.core_type = #tpu.core_type<tc>, window_params = [{transform_indices = @transform_0, window_bounds = array<i64: 72, 784>}, {pipeline_mode = #tpu.pipeline_mode<synchronous>, transform_indices = @transform_1, window_bounds = array<i64: 784, 128>}, {pipeline_mode = #tpu.pipeline_mode<synchronous>, transform_indices = @transform_2, window_bounds = array<i64: 1, 128>}, {pipeline_mode = #tpu.pipeline_mode<synchronous>, transform_indices = @transform_3, window_bounds = array<i64: 128, 128>}, {pipeline_mode = #tpu.pipeline_mode<synchronous>, transform_indices = @transform_4, window_bounds = array<i64: 1, 128>}, {pipeline_mode = #tpu.pipeline_mode<synchronous>, transform_indices = @transform_5, window_bounds = array<i64: 128, 128>}, {pipeline_mode = #tpu.pipeline_mode<synchronous>, transform_indices = @transform_6, window_bounds = array<i64: 1, 128>}, {pipeline_mode = #tpu.pipeline_mode<synchronous>, transform_indices = @transform_7, window_bounds = array<i64: 128, 128>}, {pipeline_mode = #tpu.pipeline_mode<synchronous>, transform_indices = @transform_8, window_bounds = array<i64: 1, 128>}, {transform_indices = @transform_9, window_bounds = array<i64: 72, 128>}]} {
    %c0 = arith.constant 0 : index
    %c0_0 = arith.constant 0 : index
    %0 = vector.load %arg1[%c0, %c0_0] : memref<72x784xf32, #tpu.memory_space<vmem>>, vector<72x784xf32>
    %1 = arith.truncf %0 : vector<72x784xf32> to vector<72x784xbf16>
    %c0_1 = arith.constant 0 : index
    %c0_2 = arith.constant 0 : index
    %2 = vector.load %arg2[%c0_1, %c0_2] : memref<784x128xbf16, #tpu.memory_space<vmem>>, vector<784x128xbf16>
    %cst = arith.constant dense<0.000000e+00> : vector<72x128xf32>
    %3 = tpu.matmul %1, %2, %cst {dimension_numbers = #tpu.dot_dimension_numbers<[1], [0], [0], [1], [0, 0, 1, 1], [], []>} : vector<72x784xbf16>, vector<784x128xbf16>, vector<72x128xf32> -> vector<72x128xf32>
    %c0_3 = arith.constant 0 : index
    %c0_4 = arith.constant 0 : index
    %4 = vector.load %arg3[%c0_3, %c0_4] : memref<1x128xf32, #tpu.memory_space<vmem>>, vector<1x128xf32>
    %5 = vector.broadcast %4 : vector<1x128xf32> to vector<72x128xf32>
    %6 = arith.addf %3, %5 : vector<72x128xf32>
    %cst_5 = arith.constant 0.000000e+00 : f32
    %7 = vector.broadcast %cst_5 : f32 to vector<72x128xf32>
    %8 = arith.maximumf %6, %7 : vector<72x128xf32>
    %9 = arith.truncf %8 : vector<72x128xf32> to vector<72x128xbf16>
    %c0_6 = arith.constant 0 : index
    %c0_7 = arith.constant 0 : index
    %10 = vector.load %arg4[%c0_6, %c0_7] : memref<128x128xbf16, #tpu.memory_space<vmem>>, vector<128x128xbf16>
    %cst_8 = arith.constant dense<0.000000e+00> : vector<72x128xf32>
    %11 = tpu.matmul %9, %10, %cst_8 {dimension_numbers = #tpu.dot_dimension_numbers<[1], [0], [0], [1], [0, 0, 1, 1], [], []>} : vector<72x128xbf16>, vector<128x128xbf16>, vector<72x128xf32> -> vector<72x128xf32>
    %c0_9 = arith.constant 0 : index
    %c0_10 = arith.constant 0 : index
    %12 = vector.load %arg5[%c0_9, %c0_10] : memref<1x128xf32, #tpu.memory_space<vmem>>, vector<1x128xf32>
    %13 = vector.broadcast %12 : vector<1x128xf32> to vector<72x128xf32>
    %14 = arith.addf %11, %13 : vector<72x128xf32>
    %cst_11 = arith.constant 0.000000e+00 : f32
    %15 = vector.broadcast %cst_11 : f32 to vector<72x128xf32>
    %16 = arith.maximumf %14, %15 : vector<72x128xf32>
    %17 = arith.truncf %16 : vector<72x128xf32> to vector<72x128xbf16>
    %c0_12 = arith.constant 0 : index
    %c0_13 = arith.constant 0 : index
    %18 = vector.load %arg6[%c0_12, %c0_13] : memref<128x128xbf16, #tpu.memory_space<vmem>>, vector<128x128xbf16>
    %cst_14 = arith.constant dense<0.000000e+00> : vector<72x128xf32>
    %19 = tpu.matmul %17, %18, %cst_14 {dimension_numbers = #tpu.dot_dimension_numbers<[1], [0], [0], [1], [0, 0, 1, 1], [], []>} : vector<72x128xbf16>, vector<128x128xbf16>, vector<72x128xf32> -> vector<72x128xf32>
    %c0_15 = arith.constant 0 : index
    %c0_16 = arith.constant 0 : index
    %20 = vector.load %arg7[%c0_15, %c0_16] : memref<1x128xf32, #tpu.memory_space<vmem>>, vector<1x128xf32>
    %21 = vector.broadcast %20 : vector<1x128xf32> to vector<72x128xf32>
    %22 = arith.addf %19, %21 : vector<72x128xf32>
    %cst_17 = arith.constant 0.000000e+00 : f32
    %23 = vector.broadcast %cst_17 : f32 to vector<72x128xf32>
    %24 = arith.maximumf %22, %23 : vector<72x128xf32>
    %25 = arith.truncf %24 : vector<72x128xf32> to vector<72x128xbf16>
    %c0_18 = arith.constant 0 : index
    %c0_19 = arith.constant 0 : index
    %26 = vector.load %arg8[%c0_18, %c0_19] : memref<128x128xbf16, #tpu.memory_space<vmem>>, vector<128x128xbf16>
    %cst_20 = arith.constant dense<0.000000e+00> : vector<72x128xf32>
    %27 = tpu.matmul %25, %26, %cst_20 {dimension_numbers = #tpu.dot_dimension_numbers<[1], [0], [0], [1], [0, 0, 1, 1], [], []>} : vector<72x128xbf16>, vector<128x128xbf16>, vector<72x128xf32> -> vector<72x128xf32>
    %c0_21 = arith.constant 0 : index
    %c0_22 = arith.constant 0 : index
    %28 = vector.load %arg9[%c0_21, %c0_22] : memref<1x128xf32, #tpu.memory_space<vmem>>, vector<1x128xf32>
    %29 = vector.broadcast %28 : vector<1x128xf32> to vector<72x128xf32>
    %30 = arith.addf %27, %29 : vector<72x128xf32>
    %c0_23 = arith.constant 0 : index
    %c0_24 = arith.constant 0 : index
    %31 = vector.load %arg10[%c0_23, %c0_24] : memref<72x128xf32, #tpu.memory_space<vmem>>, vector<72x128xf32>
    tpu.vector_store %arg10[%c0_23, %c0_24], %30 {strides = array<i32>} : memref<72x128xf32, #tpu.memory_space<vmem>>, vector<72x128xf32>,
    return
  }
  func.func @transform_0(%arg0: i32) -> (i32, i32) {
    %c0_i32 = arith.constant 0 : i32
    %c0_i32_0 = arith.constant 0 : i32
    return %arg0, %c0_i32 : i32, i32
  }
  func.func @transform_1(%arg0: i32) -> (i32, i32) {
    %c0_i32 = arith.constant 0 : i32
    %c0_i32_0 = arith.constant 0 : i32
    %c0_i32_1 = arith.constant 0 : i32
    return %c0_i32, %c0_i32_0 : i32, i32
  }
  func.func @transform_2(%arg0: i32) -> (i32, i32) {
    %c0_i32 = arith.constant 0 : i32
    %c0_i32_0 = arith.constant 0 : i32
    %c0_i32_1 = arith.constant 0 : i32
    return %c0_i32, %c0_i32_0 : i32, i32
  }
  func.func @transform_3(%arg0: i32) -> (i32, i32) {
    %c0_i32 = arith.constant 0 : i32
    %c0_i32_0 = arith.constant 0 : i32
    %c0_i32_1 = arith.constant 0 : i32
    return %c0_i32, %c0_i32_0 : i32, i32
  }
  func.func @transform_4(%arg0: i32) -> (i32, i32) {
    %c0_i32 = arith.constant 0 : i32
    %c0_i32_0 = arith.constant 0 : i32
    %c0_i32_1 = arith.constant 0 : i32
    return %c0_i32, %c0_i32_0 : i32, i32
  }
  func.func @transform_5(%arg0: i32) -> (i32, i32) {
    %c0_i32 = arith.constant 0 : i32
    %c0_i32_0 = arith.constant 0 : i32
    %c0_i32_1 = arith.constant 0 : i32
    return %c0_i32, %c0_i32_0 : i32, i32
  }
  func.func @transform_6(%arg0: i32) -> (i32, i32) {
    %c0_i32 = arith.constant 0 : i32
    %c0_i32_0 = arith.constant 0 : i32
    %c0_i32_1 = arith.constant 0 : i32
    return %c0_i32, %c0_i32_0 : i32, i32
  }
  func.func @transform_7(%arg0: i32) -> (i32, i32) {
    %c0_i32 = arith.constant 0 : i32
    %c0_i32_0 = arith.constant 0 : i32
    %c0_i32_1 = arith.constant 0 : i32
    return %c0_i32, %c0_i32_0 : i32, i32
  }
  func.func @transform_8(%arg0: i32) -> (i32, i32) {
    %c0_i32 = arith.constant 0 : i32
    %c0_i32_0 = arith.constant 0 : i32
    %c0_i32_1 = arith.constant 0 : i32
    return %c0_i32, %c0_i32_0 : i32, i32
  }
  func.func @transform_9(%arg0: i32) -> (i32, i32) {
    %c0_i32 = arith.constant 0 : i32
    %c0_i32_0 = arith.constant 0 : i32
    return %arg0, %c0_i32 : i32, i32
  }
}

</mosaic_0001>

<bundles_post_ra>
// kernel: dnn_forward.1
= control target key start
LH: loop header
LB: loop body
LE: loop exit
PB: predicated region body
PF: predicated region fallthrough
CT: control target
= control target key end

     0   :  { %s2351_s30 = smov 0   ;;  %s2353_s10 = smov 0   ;;  %s2802_s0 = inlined_call_operand.vmem [shape: f32[260,784], index: 0, kind: input, shape index: {}]   ;;  %s2803_s1 = inlined_call_operand.vmem [shape: bf16[784,128], index: 1, kind: input, shape index: {}]   ;;  %s2804_s2 = inlined_call_operand.vmem [shape: f32[1,128], index: 2, kind: input, shape index: {}]   ;;  %s2805_s3 = inlined_call_operand.vmem [shape: bf16[128,128], index: 3, kind: input, shape index: {}]   ;;  %s2806_s4 = inlined_call_operand.vmem [shape: f32[1,128], index: 4, kind: input, shape index: {}]   ;;  %s2807_s5 = inlined_call_operand.vmem [shape: bf16[128,128], index: 5, kind: input, shape index: {}]   ;;  %s2808_s6 = inlined_call_operand.vmem [shape: f32[1,128], index: 6, kind: input, shape index: {}]   ;;  %s2809_s7 = inlined_call_operand.vmem [shape: bf16[128,128], index: 7, kind: input, shape index: {}]   ;;  %s2810_s8 = inlined_call_operand.vmem [shape: f32[1,128], index: 8, kind: input, shape index: {}]   ;;  %s2811_s9 = inlined_call_operand.vmem [shape: f32[260,128], index: 9, kind: output, shape index: {}]  }
   0x1   :  { %s2355_s11 = smov 0  }
   0x2 LB: > { %s2364_s12 = sadd.s32 4294967295, %s2267_s11   ;;  %s2366_s13 = sadd.s32 1, %s2267_s11   ;;  %s2267_s11 = sphi %s2355_s11, %s2819_s11   ;;  %s2263_s10 = sphi %s2353_s10, %s2818_s10   ;;  %s2259_s30 = sphi %s2351_s30, %s2817_s30  }
   0x3   : > { %s217_s14 = ssub.s32 %s2267_s11, %s2366_s13  ;;  %s220_s15 = sadd.s32 1, %s2263_s10 }
   0x4   : > { %p218_p0 = scmp.eq.s32.totalorder %s217_s14, 0  ;;  %p230_p1 = scmp.ne.s32.totalorder %s2263_s10, %s2259_s30 }
   0x5   : > { %p231_p2 = scmp.eq.s32.totalorder %s2364_s12, 3  ;;  %p1711_p3 = scmp.ge.s32.totalorder %s2267_s11, 1 }
   0x6   : > { %s2374_s16 = scalar_select %p218_p0, %s2263_s10, %s220_s15  }
   0x7   : > { %p2376_p4 = por %p231_p2, %p230_p1  ;;  %p299_p5 = scmp.lt.s32.totalorder %s2267_s11, 5 }
   0x9   : > { %p300_p6 = pnand %p1711_p3, %p299_p5 }
   0xa   : > { %s2399_s11 = smul.u32 (!%p300_p6), 9, %s2364_s12  ;;  %s337_s26 = sand.u32 (!%p300_p6), 1, %s2259_s30  }
   0xb   : > { %303 = sbr.rel (%p300_p6) target bundleno = 862 (0x35e), region = 56 }
   0xc   : > { %p346_p7 = scmp.lt.s32.totalorder (!%p300_p6), %s2399_s11, 32  ;;  %s2112_s27 = smul.u32 (!%p300_p6), 72, %s337_s26 }
   0xe   : > { %s2728_s14 = scalar_lea.vmem (!%p300_p6), [#allocation2], %s2112_s27  }
  0x10   : > { %v2029_v0 = vld [vmem:[%s2803_s1 + $0x38] sm:$0xff]  ;;  %v2028_v2 = vld [vmem:[%s2803_s1 + $0x30] sm:$0xff]  ;;  %v2027_v4 = vld [vmem:[%s2803_s1 + $0x28] sm:$0xff]  ;;  %s347_s24 = scalar_select %p346_p7, %s2399_s11, 32  ;;  %vm857_vm0 = vcmask 130048  }
  0x11   : > { %v2037_v1 = vld [vmem:[%s2803_s1 + $0x78] sm:$0xff]  ;;  %2096 = vmatpush.bf16.msra.mxu2 %v2029_v0  ;;  %v2036_v3 = vld [vmem:[%s2803_s1 + $0x70] sm:$0xff]  ;;  %873 = vmatpush.bf16.msra.mxu0 %v2029_v0  ;;  %v2035_v5 = vld [vmem:[%s2803_s1 + $0x68] sm:$0xff]  ;;  %s1466_s30 = ssub.s32 (%p2376_p4), 33, %s2399_s11  ;;  %s2095_s15 = smul.u32 (%p2376_p4), 72, %s2364_s12 }
  0x12   : > { %2104 = vmatpush.bf16.msra.mxu3 %v2037_v1  ;;  %906 = vmatpush.bf16.msra.mxu1 %v2037_v1  ;;  %v2026_v6 = vld [vmem:[%s2803_s1 + $0x20] sm:$0xff]  ;;  %v2025_v8 = vld [vmem:[%s2803_s1 + $0x18] sm:$0xff]  ;;  %v2024_v10 = vld [vmem:[%s2803_s1 + $0x10] sm:$0xff]  ;;  %s2113_s29 = smul.u32 56, %s347_s24  ;;  %p1467_p8 = scmp.lt.s32.totalorder (%p2376_p4), %s1466_s30, 9 }
  0x13   : > { %v2034_v7 = vld [vmem:[%s2803_s1 + $0x60] sm:$0xff]  ;;  %v2033_v9 = vld [vmem:[%s2803_s1 + $0x58] sm:$0xff]  ;;  %v2032_v11 = vld [vmem:[%s2803_s1 + $0x50] sm:$0xff]  ;;  %s2746_s20 = scalar_lea.vmem (%p2376_p4), %s2811_s9, %s2095_s15  }
  0x14   : > { %v2023_v12 = vld [vmem:[%s2803_s1 + $0x8] sm:$0xff]  ;;  %s2430_s22 = scalar_lea.vmem %s2802_s0, %s2113_s29  ;;  %v2022_v14 = vld [vmem:[%s2803_s1] sm:$0xff]  ;;  %v2045_v20 = vld [vmem:[%s2803_s1 + $0xb8] sm:$0xff] }
  0x15   : > { %2097 = vmatpush.bf16.msra.mxu2 %v2028_v2  ;;  %874 = vmatpush.bf16.msra.mxu0 %v2028_v2  ;;  %v2031_v13 = vld [vmem:[%s2803_s1 + $0x48] sm:$0xff]  ;;  %v2030_v15 = vld [vmem:[%s2803_s1 + $0x40] sm:$0xff]  ;;  %v398_v17 = vld [vmem:[%s2430_s22 + $0x118] sm:$0xff] }
  0x16   : > { %2105 = vmatpush.bf16.msra.mxu3 %v2036_v3  ;;  %907 = vmatpush.bf16.msra.mxu1 %v2036_v3  ;;  %v391_v16 = vld [vmem:[%s2430_s22 + $0xe0] sm:$0xff]  ;;  %v392_v18 = vld [vmem:[%s2430_s22 + $0xe8] sm:$0xff]  ;;  %v2053_v21 = vld [vmem:[%s2803_s1 + $0xf8] sm:$0xff] }
  0x17   : > { %v399_v19 = vld [vmem:[%s2430_s22 + $0x120] sm:$0xff]  ;;  %v440_v23 = vpack.c.bf16 %v398_v17, %v391_v16  ;;  %v370_v25 = vld [vmem:[%s2430_s22 + $0x38] sm:$0xff]  ;;  %v364_v26 = vld [vmem:[%s2430_s22 + $0x8] sm:$0xff] }
  0x18   : > { %v363_v22 = vld [vmem:[%s2430_s22] sm:$0xff]  ;;  %v441_v24 = vpack.c.bf16 %v399_v19, %v392_v18  ;;  %v2061_v28 = vld [vmem:[%s2803_s1 + $0x138] sm:$0xff]  ;;  %v2044_v30 = vld [vmem:[%s2803_s1 + $0xb0] sm:$0xff] }
  0x19   : > { %2098 = vmatpush.bf16.msra.mxu2 %v2027_v4  ;;  %875 = vmatpush.bf16.msra.mxu0 %v2027_v4  ;;  %v371_v27 = vld [vmem:[%s2430_s22 + $0x40] sm:$0xff]  ;;  %v2069_v29 = vld [vmem:[%s2803_s1 + $0x178] sm:$0xff]  ;;  %v2052_v31 = vld [vmem:[%s2803_s1 + $0xf0] sm:$0xff]  ;;  %v426_v32 = vpack.c.bf16 %v370_v25, %v363_v22 }
  0x1a   : > { %2106 = vmatpush.bf16.msra.mxu3 %v2035_v5  ;;  %908 = vmatpush.bf16.msra.mxu1 %v2035_v5  ;;  %v427_v33 = vpack.c.bf16 %v371_v27, %v364_v26  ;;  %v2060_v34 = vld [vmem:[%s2803_s1 + $0x130] sm:$0xff]  ;;  %v2043_v36 = vld [vmem:[%s2803_s1 + $0xa8] sm:$0xff]  ;;  %v2042_v40 = vld [vmem:[%s2803_s1 + $0xa0] sm:$0xff] }
  0x1b   : > { %v2068_v35 = vld [vmem:[%s2803_s1 + $0x170] sm:$0xff]  ;;  %v2051_v37 = vld [vmem:[%s2803_s1 + $0xe8] sm:$0xff]  ;;  %v2050_v41 = vld [vmem:[%s2803_s1 + $0xe0] sm:$0xff] }
  0x1c   : > { %v2059_v38 = vld [vmem:[%s2803_s1 + $0x128] sm:$0xff]  ;;  %v405_v42 = vld [vmem:[%s2430_s22 + $0x150] sm:$0xff]  ;;  %v406_v44 = vld [vmem:[%s2430_s22 + $0x158] sm:$0xff] }
  0x1d   : > { %2099 = vmatpush.bf16.msra.mxu2 %v2026_v6  ;;  %876 = vmatpush.bf16.msra.mxu0 %v2026_v6  ;;  %v2067_v39 = vld [vmem:[%s2803_s1 + $0x168] sm:$0xff]  ;;  %v413_v45 = vld [vmem:[%s2430_s22 + $0x190] sm:$0xff]  ;;  %v2058_v46 = vld [vmem:[%s2803_s1 + $0x120] sm:$0xff] }
  0x1e   : > { %2107 = vmatpush.bf16.msra.mxu3 %v2034_v7  ;;  %909 = vmatpush.bf16.msra.mxu1 %v2034_v7  ;;  %v412_v43 = vld [vmem:[%s2430_s22 + $0x188] sm:$0xff]  ;;  %v2066_v47 = vld [vmem:[%s2803_s1 + $0x160] sm:$0xff]  ;;  %v2041_v48 = vld [vmem:[%s2803_s1 + $0x98] sm:$0xff]  ;;  %v448_v52 = vpack.c.bf16 %v413_v45, %v406_v44 }
  0x1f   : > { %v2049_v49 = vld [vmem:[%s2803_s1 + $0xd8] sm:$0xff]  ;;  %v377_v50 = vld [vmem:[%s2430_s22 + $0x70] sm:$0xff]  ;;  %v447_v51 = vpack.c.bf16 %v412_v43, %v405_v42  ;;  %v384_v53 = vld [vmem:[%s2430_s22 + $0xa8] sm:$0xff] }
  0x20   : > { %v378_v54 = vld [vmem:[%s2430_s22 + $0x78] sm:$0xff]  ;;  %v385_v55 = vld [vmem:[%s2430_s22 + $0xb0] sm:$0xff]  ;;  %v433_v60 = vpack.c.bf16 %v384_v53, %v377_v50  ;;  %v2039_v0 = vld [vmem:[%s2803_s1 + $0x88] sm:$0xff] }
  0x21   : > { %2100 = vmatpush.bf16.msra.mxu2 %v2025_v8  ;;  %877 = vmatpush.bf16.msra.mxu0 %v2025_v8  ;;  %v2057_v56 = vld [vmem:[%s2803_s1 + $0x118] sm:$0xff]  ;;  %v2040_v58 = vld [vmem:[%s2803_s1 + $0x90] sm:$0xff]  ;;  %v434_v61 = vpack.c.bf16 %v385_v55, %v378_v54  ;;  %v2047_v1 = vld [vmem:[%s2803_s1 + $0xc8] sm:$0xff] }
  0x22   : > { %2108 = vmatpush.bf16.msra.mxu3 %v2033_v9  ;;  %910 = vmatpush.bf16.msra.mxu1 %v2033_v9  ;;  %v2065_v57 = vld [vmem:[%s2803_s1 + $0x158] sm:$0xff]  ;;  %v2048_v59 = vld [vmem:[%s2803_s1 + $0xd0] sm:$0xff]  ;;  %v2055_v2 = vld [vmem:[%s2803_s1 + $0x108] sm:$0xff] }
  0x23   : > { %v2056_v62 = vld [vmem:[%s2803_s1 + $0x110] sm:$0xff]  ;;  %v2063_v3 = vld [vmem:[%s2803_s1 + $0x148] sm:$0xff]  ;;  %v2038_v4 = vld [vmem:[%s2803_s1 + $0x80] sm:$0xff] }
  0x24   : > { %v2064_v63 = vld [vmem:[%s2803_s1 + $0x150] sm:$0xff]  ;;  %v2046_v5 = vld [vmem:[%s2803_s1 + $0xc0] sm:$0xff]  ;;  %v420_v8 = vld [vmem:[%s2430_s22 + $0x1c8] sm:$0xff] }
  0x25   : > { %2101 = vmatpush.bf16.msra.mxu2 %v2024_v10  ;;  %878 = vmatpush.bf16.msra.mxu0 %v2024_v10  ;;  %v2070_v6 = vld [vmem:[%s2803_s1 + $0x180] sm:$0xff]  ;;  %v365_v19 = vld [vmem:[%s2430_s22 + $0x10] sm:$0xff]  ;;  %v388_v26 = vld [vmem:[%s2430_s22 + $0xc8] sm:$0xff] }
  0x26   : > { %2109 = vmatpush.bf16.msra.mxu3 %v2032_v11  ;;  %911 = vmatpush.bf16.msra.mxu1 %v2032_v11  ;;  %v419_v7 = vld [vmem:[%s2430_s22 + $0x1c0] sm:$0xff]  ;;  %v373_v22 = vld [vmem:[%s2430_s22 + $0x50] sm:$0xff]  ;;  %v382_v27 = vld [vmem:[%s2430_s22 + $0x98] sm:$0xff] }
  0x27   : > { %v2054_v9 = vld [vmem:[%s2803_s1 + $0x100] sm:$0xff]  ;;  %v393_v43 = vld [vmem:[%s2430_s22 + $0xf0] sm:$0xff]  ;;  %v400_v44 = vld [vmem:[%s2430_s22 + $0x128] sm:$0xff] }
  0x28   : > { %v2062_v10 = vld [vmem:[%s2803_s1 + $0x140] sm:$0xff]  ;;  %v394_v45 = vld [vmem:[%s2430_s22 + $0xf8] sm:$0xff]  ;;  %v416_v50 = vld [vmem:[%s2430_s22 + $0x1a8] sm:$0xff] }
  0x29   : > { %2102 = vmatpush.bf16.msra.mxu2 %v2023_v12  ;;  %879 = vmatpush.bf16.msra.mxu0 %v2023_v12  ;;  %v367_v11 = vld [vmem:[%s2430_s22 + $0x20] sm:$0xff]  ;;  %v454_v12 = vpack.c.bf16 %v419_v7, %v419_v7 }
  0x2a   : > { %2110 = vmatpush.bf16.msra.mxu3 %v2031_v13  ;;  %912 = vmatpush.bf16.msra.mxu1 %v2031_v13  ;;  %v455_v13 = vpack.c.bf16 %v420_v8, %v420_v8  ;;  %v375_v16 = vld [vmem:[%s2430_s22 + $0x60] sm:$0xff] }
  0x2b   : > { %v407_v55 = vld [vmem:[%s2430_s22 + $0x160] sm:$0xff] }
  0x2c   : > { %v2596_v8 = vld [vmem:[%s2804_s2] ss:$0 sm:$0xff] }
  0x2d   : > { %2103 = vmatpush.bf16.msra.mxu2 %v2022_v14  ;;  %880 = vmatpush.bf16.msra.mxu0 %v2022_v14  ;;  %v374_v14 = vld [vmem:[%s2430_s22 + $0x58] sm:$0xff] }
  0x2e   : > { %2111 = vmatpush.bf16.msra.mxu3 %v2030_v15  ;;  %913 = vmatpush.bf16.msra.mxu1 %v2030_v15  ;;  %v368_v15 = vld [vmem:[%s2430_s22 + $0x28] sm:$0xff]  ;;  %v430_v17 = vpack.c.bf16 %v374_v14, %v367_v11 }
  0x2f   : > { %v431_v18 = vpack.c.bf16 %v375_v16, %v368_v15 }
  0x30   : > { %891 = vmatmul.bf16.vlgmr.msra.gmra.mxu2 %v440_v23  ;;  %881 = vmatmul.bf16.vlgmr.msra.gmra.mxu0 %v426_v32  ;;  %v381_v23 = vld [vmem:[%s2430_s22 + $0x90] sm:$0xff]  ;;  %v386_v32 = vld [vmem:[%s2430_s22 + $0xb8] sm:$0xff] }
  0x31   : > { %939 = vmatpush.bf16.msrb.mxu2 %v2045_v20  ;;  %924 = vmatmul.bf16.vlgmr.msra.gmra.mxu3 %v441_v24  ;;  %v372_v20 = vld [vmem:[%s2430_s22 + $0x48] sm:$0xff] }
  0x32   : > { %972 = vmatpush.bf16.msrb.mxu3 %v2053_v21  ;;  %1005 = vmatpush.bf16.msrb.mxu0 %v2061_v28  ;;  %v366_v21 = vld [vmem:[%s2430_s22 + $0x18] sm:$0xff]  ;;  %v428_v24 = vpack.c.bf16 %v372_v20, %v365_v19  ;;  %v389_v28 = vld [vmem:[%s2430_s22 + $0xd0] sm:$0xff]  ;;  %v383_v19 = vld [vmem:[%s2430_s22 + $0xa0] sm:$0xff] }
  0x33   : > { %1038 = vmatpush.bf16.msrb.mxu1 %v2069_v29  ;;  %v429_v25 = vpack.c.bf16 %v373_v22, %v366_v21  ;;  %v437_v29 = vpack.c.bf16 %v388_v26, %v381_v23  ;;  %v390_v20 = vld [vmem:[%s2430_s22 + $0xd8] sm:$0xff] }
  0x34   : > { %914 = vmatmul.bf16.vlgmr.msra.gmra.mxu1 %v427_v33  ;;  %v380_v33 = vld [vmem:[%s2430_s22 + $0x88] sm:$0xff] }
  0x35   : > { %940 = vmatpush.bf16.msrb.mxu2 %v2044_v30  ;;  %v438_v30 = vpack.c.bf16 %v389_v28, %v382_v27 }
  0x36   : > { %973 = vmatpush.bf16.msrb.mxu3 %v2052_v31  ;;  %1006 = vmatpush.bf16.msrb.mxu0 %v2060_v34  ;;  %v379_v31 = vld [vmem:[%s2430_s22 + $0x80] sm:$0xff] }
  0x37   : > { %1039 = vmatpush.bf16.msrb.mxu1 %v2068_v35  ;;  %v387_v34 = vld [vmem:[%s2430_s22 + $0xc0] sm:$0xff] }
  0x38   : > { %v395_v35 = vld [vmem:[%s2430_s22 + $0x100] sm:$0xff] }
  0x39   : > { %941 = vmatpush.bf16.msrb.mxu2 %v2043_v36  ;;  %v435_v36 = vpack.c.bf16 %v386_v32, %v379_v31 }
  0x3a   : > { %974 = vmatpush.bf16.msrb.mxu3 %v2051_v37  ;;  %1007 = vmatpush.bf16.msrb.mxu0 %v2059_v38  ;;  %v436_v37 = vpack.c.bf16 %v387_v34, %v380_v33  ;;  %v402_v38 = vld [vmem:[%s2430_s22 + $0x138] sm:$0xff] }
  0x3b   : > { %1040 = vmatpush.bf16.msrb.mxu1 %v2067_v39  ;;  %v396_v39 = vld [vmem:[%s2430_s22 + $0x108] sm:$0xff] }
  0x3d   : > { %942 = vmatpush.bf16.msrb.mxu2 %v2042_v40  ;;  %v403_v40 = vld [vmem:[%s2430_s22 + $0x140] sm:$0xff] }
  0x3e   : > { %975 = vmatpush.bf16.msrb.mxu3 %v2050_v41  ;;  %1008 = vmatpush.bf16.msrb.mxu0 %v2058_v46  ;;  %v444_v41 = vpack.c.bf16 %v402_v38, %v395_v35  ;;  %v445_v42 = vpack.c.bf16 %v403_v40, %v396_v39  ;;  %v401_v46 = vld [vmem:[%s2430_s22 + $0x130] sm:$0xff] }
  0x3f   : > { %1041 = vmatpush.bf16.msrb.mxu1 %v2066_v47  ;;  %v409_v47 = vld [vmem:[%s2430_s22 + $0x170] sm:$0xff] }
  0x40   : > { %896 = vmatmul.bf16.gmra.mxu2 %v447_v51  ;;  %886 = vmatmul.bf16.gmra.mxu0 %v433_v60  ;;  %v410_v51 = vld [vmem:[%s2430_s22 + $0x178] sm:$0xff]  ;;  %v451_v53 = vpack.c.bf16 %v416_v50, %v409_v47 }
  0x41   : > { %943 = vmatpush.bf16.msrb.mxu2 %v2041_v48  ;;  %929 = vmatmul.bf16.gmra.mxu3 %v448_v52  ;;  %v442_v48 = vpack.c.bf16 %v400_v44, %v393_v43  ;;  %v417_v52 = vld [vmem:[%s2430_s22 + $0x1b0] sm:$0xff]  ;;  %v2078_v47 = vld [vmem:[%s2805_s3 + $0x38] sm:$0xff] }
  0x42   : > { %976 = vmatpush.bf16.msrb.mxu3 %v2049_v49  ;;  %1009 = vmatpush.bf16.msrb.mxu0 %v2057_v56  ;;  %v443_v49 = vpack.c.bf16 %v401_v46, %v394_v45  ;;  %v452_v54 = vpack.c.bf16 %v417_v52, %v410_v51  ;;  %v414_v56 = vld [vmem:[%s2430_s22 + $0x198] sm:$0xff] }
  0x43   : > { %1042 = vmatpush.bf16.msrb.mxu1 %v2065_v57  ;;  %v408_v57 = vld [vmem:[%s2430_s22 + $0x168] sm:$0xff] }
  0x44   : > { %919 = vmatmul.bf16.gmra.mxu1 %v434_v61  ;;  %v423_v61 = vld [vmem:[%s2430_s22 + $0x1e0] sm:$0xff] }
  0x45   : > { %944 = vmatpush.bf16.msrb.mxu2 %v2040_v58  ;;  %v415_v58 = vld [vmem:[%s2430_s22 + $0x1a0] sm:$0xff] }
  0x46   : > { %977 = vmatpush.bf16.msrb.mxu3 %v2048_v59  ;;  %1010 = vmatpush.bf16.msrb.mxu0 %v2056_v62  ;;  %v449_v59 = vpack.c.bf16 %v414_v56, %v407_v55  ;;  %v450_v60 = vpack.c.bf16 %v415_v58, %v408_v57  ;;  %v424_v62 = vld [vmem:[%s2430_s22 + $0x1e8] sm:$0xff]  ;;  %v418_v55 = vld [vmem:[%s2430_s22 + $0x1b8] sm:$0xff] }
  0x47   : > { %1043 = vmatpush.bf16.msrb.mxu1 %v2064_v63  ;;  %v458_v63 = vpack.c.bf16 %v423_v61, %v423_v61 }
  0x49   : > { %945 = vmatpush.bf16.msrb.mxu2 %v2039_v0  ;;  %v459_v0 = vpack.c.bf16 %v424_v62, %v424_v62 }
  0x4a   : > { %978 = vmatpush.bf16.msrb.mxu3 %v2047_v1  ;;  %1011 = vmatpush.bf16.msrb.mxu0 %v2055_v2  ;;  %v421_v1 = vld [vmem:[%s2430_s22 + $0x1d0] sm:$0xff]  ;;  %v422_v2 = vld [vmem:[%s2430_s22 + $0x1d8] sm:$0xff] }
  0x4b   : > { %1044 = vmatpush.bf16.msrb.mxu1 %v2063_v3  ;;  %v456_v3 = vpack.c.bf16 %v421_v1, %v421_v1 }
  0x4d   : > { %946 = vmatpush.bf16.msrb.mxu2 %v2038_v4  ;;  %v457_v4 = vpack.c.bf16 %v422_v2, %v422_v2  ;;  %v2076_v2 = vld [vmem:[%s2805_s3 + $0x28] sm:$0xff] }
  0x4e   : > { %979 = vmatpush.bf16.msrb.mxu3 %v2046_v5  ;;  %1012 = vmatpush.bf16.msrb.mxu0 %v2054_v9  ;;  %v369_v5 = vld [vmem:[%s2430_s22 + $0x30] sm:$0xff] }
  0x4f   : > { %1045 = vmatpush.bf16.msrb.mxu1 %v2062_v10 }
  0x50   : > { %901 = vmatmul.bf16.gmra.mxu2 %v454_v12 }
  0x51   : > { %1078 = vmatpush.bf16.msra.mxu2 %v2070_v6  ;;  %934 = vmatmul.bf16.gmra.mxu3 %v455_v13  ;;  %v376_v6 = vld [vmem:[%s2430_s22 + $0x68] sm:$0xff] }
  0x52   : > { %1013 = vmatmul.bf16.vlgmr.msrb.gmra.mxu0 %v430_v17  ;;  %v432_v7 = vpack.c.bf16 %v376_v6, %v369_v5  ;;  %1186 = vmatpush.bf16.msra.mxu3 %v2078_v47  ;;  %v425_v6 = vld [vmem:[%s2430_s22 + $0x1f0] sm:$0xff] }
  0x54   : > { %1046 = vmatmul.bf16.vlgmr.msrb.gmra.mxu1 %v431_v18 }
  0x60   : > { %947 = vmatmul.bf16.vlgmr.msrb.gmra.mxu2 %v428_v24 }
  0x61   : > { %980 = vmatmul.bf16.vlgmr.msrb.gmra.mxu3 %v429_v25  ;;  %v439_v25 = vpack.c.bf16 %v390_v20, %v383_v19 }
  0x62   : > { %1018 = vmatmul.bf16.gmra.mxu0 %v437_v29 }
  0x64   : > { %1051 = vmatmul.bf16.gmra.mxu1 %v438_v30 }
  0x70   : > { %952 = vmatmul.bf16.gmra.mxu2 %v435_v36  ;;  %v397_v36 = vld [vmem:[%s2430_s22 + $0x110] sm:$0xff] }
  0x71   : > { %985 = vmatmul.bf16.gmra.mxu3 %v436_v37  ;;  %v404_v37 = vld [vmem:[%s2430_s22 + $0x148] sm:$0xff] }
  0x72   : > { %1023 = vmatmul.bf16.gmra.mxu0 %v444_v41  ;;  %v446_v43 = vpack.c.bf16 %v404_v37, %v397_v36 }
  0x74   : > { %1056 = vmatmul.bf16.gmra.mxu1 %v445_v42 }
  0x80   : > { %957 = vmatmul.bf16.gmra.mxu2 %v442_v48 }
  0x81   : > { %990 = vmatmul.bf16.gmra.mxu3 %v443_v49 }
  0x82   : > { %1028 = vmatmul.bf16.gmra.mxu0 %v451_v53 }
  0x84   : > { %1061 = vmatmul.bf16.gmra.mxu1 %v452_v54  ;;  %v411_v54 = vld [vmem:[%s2430_s22 + $0x180] sm:$0xff] }
  0x85   : > { %v453_v58 = vpack.c.bf16 %v418_v55, %v411_v54 }
  0x90   : > { %962 = vmatmul.bf16.gmra.mxu2 %v449_v59  ;;  %v2077_v59 = vld [vmem:[%s2805_s3 + $0x30] sm:$0xff] }
  0x91   : > { %995 = vmatmul.bf16.gmra.mxu3 %v450_v60 }
  0x92   : > { %1033 = vmatmul.bf16.gmra.mxu0 %v458_v63  ;;  %1187 = vmatpush.bf16.msra.mxu3 %v2077_v59 }
  0x94   : > { %1066 = vmatmul.bf16.gmra.mxu1 %v459_v0 }
  0x96   : > { %1188 = vmatpush.bf16.msra.mxu3 %v2076_v2 }
  0xa0   : > { %967 = vmatmul.bf16.gmra.mxu2 %v456_v3 }
  0xa1   : > { %1000 = vmatmul.bf16.gmra.mxu3 %v457_v4 }
  0xad   : > { %v882_v9 = vpop.f32.mrf.mxu0 }
  0xae   : > { %v883_v11 = vadd.f32 %v2596_v8, %v882_v9 }
  0xb0   : > { %1909 = vmatmul.msk.bf16.vlgmr.msra.gmra.mxu2 %vm857_vm0, %v432_v7 }
  0xb1   : > { %v915_v10 = vpop.f32.mrf.mxu1 }
  0xb2   : > { %v916_v14 = vadd.f32 %v915_v10, %v883_v11 }
  0xb3   : > { %v892_v12 = vpop.f32.mrf.mxu2 }
  0xb4   : > { %v925_v13 = vpop.f32.mrf.mxu3  ;;  %v893_v15 = vadd.f32 %v2596_v8, %v892_v12  ;;  %v460_v12 = vpack.c.bf16 %v425_v6, %v425_v6 }
  0xb5   : > { %v884_v17 = vpop.f32.mrf.mxu0 }
  0xb6   : > { %v2601_v16 = vadd.f32 %v925_v13, %v893_v15  ;;  %v885_v21 = vadd.f32 %v2596_v8, %v884_v17 }
  0xb9   : > { %v917_v18 = vpop.f32.mrf.mxu1 }
  0xba   : > { %v918_v24 = vadd.f32 %v917_v18, %v885_v21  ;;  %v2075_v18 = vld [vmem:[%s2805_s3 + $0x20] sm:$0xff] }
  0xbb   : > { %v2606_v22 = vpop.f32.mrf.mxu2  ;;  %1189 = vmatpush.bf16.msra.mxu3 %v2075_v18 }
  0xbc   : > { %v2608_v23 = vpop.f32.mrf.mxu3 }
  0xbd   : > { %v887_v26 = vpop.f32.mrf.mxu0 }
  0xbe   : > { %v888_v28 = vadd.f32 %v2596_v8, %v887_v26 }
  0xc0   : > { %1910 = vmatmul.msk.bf16.gmra.mxu2 %vm857_vm0, %v439_v25 }
  0xc1   : > { %v920_v27 = vpop.f32.mrf.mxu1 }
  0xc2   : > { %v921_v31 = vadd.f32 %v920_v27, %v888_v28 }
  0xc3   : > { %v897_v29 = vpop.f32.mrf.mxu2 }
  0xc4   : > { %v930_v30 = vpop.f32.mrf.mxu3  ;;  %v898_v32 = vadd.f32 %v2596_v8, %v897_v29 }
  0xc5   : > { %v889_v34 = vpop.f32.mrf.mxu0 }
  0xc6   : > { %v2613_v33 = vadd.f32 %v930_v30, %v898_v32  ;;  %v890_v38 = vadd.f32 %v2596_v8, %v889_v34  ;;  %v2074_v30 = vld [vmem:[%s2805_s3 + $0x18] sm:$0xff] }
  0xc7   : > { %1190 = vmatpush.bf16.msra.mxu3 %v2074_v30 }
  0xc9   : > { %v922_v35 = vpop.f32.mrf.mxu1 }
  0xca   : > { %v923_v41 = vadd.f32 %v922_v35, %v890_v38 }
  0xcb   : > { %v899_v39 = vpop.f32.mrf.mxu2 }
  0xcc   : > { %v932_v40 = vpop.f32.mrf.mxu3  ;;  %v900_v42 = vadd.f32 %v2596_v8, %v899_v39 }
  0xce   : > { %v2619_v44 = vadd.f32 %v932_v40, %v900_v42 }
  0xcf   : > { %v1014_v45 = vpop.f32.mrf.mxu0 }
  0xd0   : > { %1911 = vmatmul.msk.bf16.gmra.mxu2 %vm857_vm0, %v446_v43 }
  0xd1   : > { %v1047_v46 = vpop.f32.mrf.mxu1 }
  0xd3   : > { %v902_v48 = vpop.f32.mrf.mxu2 }
  0xd4   : > { %v935_v49 = vpop.f32.mrf.mxu3  ;;  %v903_v50 = vadd.f32 %v2596_v8, %v902_v48 }
  0xd6   : > { %v2626_v51 = vadd.f32 %v935_v49, %v903_v50 }
  0xd7   : > { %v1016_v52 = vpop.f32.mrf.mxu0 }
  0xd9   : > { %v1049_v53 = vpop.f32.mrf.mxu1 }
  0xdb   : > { %v904_v56 = vpop.f32.mrf.mxu2 }
  0xdc   : > { %v937_v57 = vpop.f32.mrf.mxu3 }
  0xdf   : > { %v1019_v60 = vpop.f32.mrf.mxu0 }
  0xe0   : > { %1912 = vmatmul.msk.bf16.gmra.mxu2 %vm857_vm0, %v453_v58 }
  0xe1   : > { %v1052_v61 = vpop.f32.mrf.mxu1 }
  0xe3   : > { %v948_v62 = vpop.f32.mrf.mxu2 }
  0xe4   : > { %v981_v63 = vpop.f32.mrf.mxu3  ;;  %v949_v0 = vadd.f32 %v948_v62, %v916_v14 }
  0xe6   : > { %v982_v1 = vadd.f32 %v981_v63, %v949_v0 }
  0xe7   : > { %v1021_v4 = vpop.f32.mrf.mxu0 }
  0xe8   : > { %v1015_v3 = vadd.f32 %v1014_v45, %v982_v1  ;;  %v2073_v45 = vld [vmem:[%s2805_s3 + $0x10] sm:$0xff] }
  0xe9   : > { %v1054_v5 = vpop.f32.mrf.mxu1  ;;  %1191 = vmatpush.bf16.msra.mxu3 %v2073_v45 }
  0xea   : > { %v2638_v7 = vadd.f32 %v1047_v46, %v1015_v3  ;;  %v895_v46 = vadd.f32 %v2596_v8, %v2606_v22 }
  0xeb   : > { %v950_v9 = vpop.f32.mrf.mxu2 }
  0xec   : > { %v983_v10 = vpop.f32.mrf.mxu3  ;;  %v951_v11 = vadd.f32 %v950_v9, %v918_v24  ;;  %v928_v50 = vadd.f32 %v2608_v23, %v895_v46  ;;  %v2071_v23 = vld [vmem:[%s2805_s3] sm:$0xff] }
  0xee   : > { %v984_v13 = vadd.f32 %v983_v10, %v951_v11 }
  0xef   : > { %v1024_v14 = vpop.f32.mrf.mxu0 }
  0xf0   : > { %v1017_v15 = vadd.f32 %v1016_v52, %v984_v13  ;;  %1913 = vmatmul.msk.bf16.gmra.mxu2 %vm857_vm0, %v460_v12 }
  0xf1   : > { %v1057_v17 = vpop.f32.mrf.mxu1 }
  0xf2   : > { %v2644_v19 = vadd.f32 %v1049_v53, %v1017_v15 }
  0xf3   : > { %v953_v20 = vpop.f32.mrf.mxu2 }
  0xf4   : > { %v986_v21 = vpop.f32.mrf.mxu3  ;;  %v954_v25 = vadd.f32 %v953_v20, %v921_v31 }
  0xf6   : > { %v987_v26 = vadd.f32 %v986_v21, %v954_v25 }
  0xf7   : > { %v1026_v24 = vpop.f32.mrf.mxu0 }
  0xf8   : > { %v1020_v27 = vadd.f32 %v1019_v60, %v987_v26 }
  0xf9   : > { %v1059_v28 = vpop.f32.mrf.mxu1 }
  0xfa   : > { %v2646_v29 = vadd.f32 %v1052_v61, %v1020_v27 }
  0xfb   : > { %v955_v32 = vpop.f32.mrf.mxu2 }
  0xfc   : > { %v988_v34 = vpop.f32.mrf.mxu3  ;;  %v956_v35 = vadd.f32 %v955_v32, %v923_v41 }
  0xfe   : > { %v989_v36 = vadd.f32 %v988_v34, %v956_v35 }
  0xff   : > { %v1029_v38 = vpop.f32.mrf.mxu0 }
 0x100   : > { %v1022_v37 = vadd.f32 %v1021_v4, %v989_v36 }
 0x101   : > { %v1062_v39 = vpop.f32.mrf.mxu1 }
 0x102   : > { %v1055_v40 = vadd.f32 %v1054_v5, %v1022_v37 }
 0x103   : > { %v958_v31 = vpop.f32.mrf.mxu2 }
 0x104   : > { %v991_v42 = vpop.f32.mrf.mxu3  ;;  %v959_v43 = vadd.f32 %v958_v31, %v2601_v16  ;;  %v2072_v16 = vld [vmem:[%s2805_s3 + $0x8] sm:$0xff] }
 0x105   : > { %1192 = vmatpush.bf16.msra.mxu3 %v2072_v16  ;;  %v2081_v16 = vld [vmem:[%s2807_s5 + $0x10] sm:$0xff] }
 0x106   : > { %v992_v47 = vadd.f32 %v991_v42, %v959_v43  ;;  %v2086_v43 = vld [vmem:[%s2807_s5 + $0x38] sm:$0xff] }
 0x107   : > { %v1031_v48 = vpop.f32.mrf.mxu0  ;;  %1301 = vmatpush.bf16.msra.mxu0 %v2086_v43 }
 0x108   : > { %v1025_v41 = vadd.f32 %v1024_v14, %v992_v47 }
 0x109   : > { %v1064_v49 = vpop.f32.mrf.mxu1  ;;  %1193 = vmatpush.bf16.msra.mxu3 %v2071_v23 }
 0x10a   : > { %v1058_v52 = vadd.f32 %v1057_v17, %v1025_v41 }
 0x10b   : > { %v960_v53 = vpop.f32.mrf.mxu2 }
 0x10c   : > { %v993_v54 = vpop.f32.mrf.mxu3  ;;  %v961_v55 = vadd.f32 %v960_v53, %v928_v50  ;;  %v2082_v53 = vld [vmem:[%s2807_s5 + $0x18] sm:$0xff] }
 0x10e   : > { %v994_v56 = vadd.f32 %v993_v54, %v961_v55 }
 0x10f   : > { %v1034_v58 = vpop.f32.mrf.mxu0 }
 0x110   : > { %v1027_v57 = vadd.f32 %v1026_v24, %v994_v56  ;;  %v2080_v56 = vld [vmem:[%s2807_s5 + $0x8] sm:$0xff] }
 0x111   : > { %v1067_v8 = vpop.f32.mrf.mxu1 }
 0x112   : > { %v1060_v22 = vadd.f32 %v1059_v28, %v1027_v57 }
 0x113   : > { %v963_v59 = vpop.f32.mrf.mxu2 }
 0x114   : > { %v996_v60 = vpop.f32.mrf.mxu3  ;;  %v964_v61 = vadd.f32 %v963_v59, %v2613_v33 }
 0x116   : > { %v997_v62 = vadd.f32 %v996_v60, %v964_v61  ;;  %v2204_v60 = vld [vmem:[%s2806_s4] ss:$0 sm:$0xff] }
 0x117   : > { %v1036_v0 = vpop.f32.mrf.mxu0 }
 0x118   : > { %v1030_v63 = vadd.f32 %v1029_v38, %v997_v62 }
 0x119   : > { %v1069_v1 = vpop.f32.mrf.mxu1 }
 0x11a   : > { %v1063_v2 = vadd.f32 %v1062_v39, %v1030_v63 }
 0x11b   : > { %v965_v3 = vpop.f32.mrf.mxu2 }
 0x11c   : > { %v998_v4 = vpop.f32.mrf.mxu3  ;;  %v966_v5 = vadd.f32 %v965_v3, %v2619_v44 }
 0x11e   : > { %v999_v6 = vadd.f32 %v998_v4, %v966_v5 }
 0x120   : > { %v1032_v9 = vadd.f32 %v1031_v48, %v999_v6  ;;  %v2083_v48 = vld [vmem:[%s2807_s5 + $0x20] sm:$0xff] }
 0x122   : > { %v1065_v10 = vadd.f32 %v1064_v49, %v1032_v9 }
 0x123   : > { %v968_v11 = vpop.f32.mrf.mxu2 }
 0x124   : > { %v1001_v12 = vpop.f32.mrf.mxu3  ;;  %v969_v33 = vadd.f32 %v968_v11, %v2626_v51 }
 0x126   : > { %v1002_v13 = vadd.f32 %v1001_v12, %v969_v33 }
 0x128   : > { %v1035_v15 = vadd.f32 %v1034_v58, %v1002_v13  ;;  %v2094_v13 = vld [vmem:[%s2809_s7 + $0x38] sm:$0xff] }
 0x129   : > { %1416 = vmatpush.bf16.msra.mxu1 %v2094_v13 }
 0x12a   : > { %v1068_v14 = vadd.f32 %v1067_v8, %v1035_v15 }
 0x12b   : > { %v970_v17 = vpop.f32.mrf.mxu2 }
 0x12c   : > { %v1003_v18 = vpop.f32.mrf.mxu3 }
 0x133   : > { %v1080_v20 = vpop.f32.mrf.mxu2 }
 0x134   : > { %v1081_v21 = vadd.f32 %v1080_v20, %v2638_v7  ;;  %v2093_v20 = vld [vmem:[%s2809_s7 + $0x30] sm:$0xff] }
 0x135   : > { %1417 = vmatpush.bf16.msra.mxu1 %v2093_v20 }
 0x136   : > { %v1104_v27 = vmax.f32 %v1081_v21, 0.0 }
 0x13b   : > { %v1082_v25 = vpop.f32.mrf.mxu2 }
 0x13c   : > { %v1083_v26 = vadd.f32 %v1082_v25, %v2644_v19  ;;  %v2092_v25 = vld [vmem:[%s2809_s7 + $0x28] sm:$0xff] }
 0x13d   : > { %1418 = vmatpush.bf16.msra.mxu1 %v2092_v25 }
 0x13e   : > { %v1105_v44 = vmax.f32 %v1083_v26, 0.0  ;;  %v2091_v26 = vld [vmem:[%s2809_s7 + $0x20] sm:$0xff] }
 0x140   : > { %v1113_v24 = vpack.c.bf16 %v1105_v44, %v1104_v27 }
 0x141   : > { %1419 = vmatpush.bf16.msra.mxu1 %v2091_v26 }
 0x142   : > { %1194 = vmatmul.bf16.vlgmr.msra.gmra.mxu3 %v1113_v24 }
 0x143   : > { %v1085_v28 = vpop.f32.mrf.mxu2 }
 0x144   : > { %v1086_v30 = vadd.f32 %v1085_v28, %v2646_v29  ;;  %v2085_v29 = vld [vmem:[%s2807_s5 + $0x30] sm:$0xff]  ;;  %v2090_v28 = vld [vmem:[%s2809_s7 + $0x18] sm:$0xff] }
 0x145   : > { %1302 = vmatpush.bf16.msra.mxu0 %v2085_v29  ;;  %1420 = vmatpush.bf16.msra.mxu1 %v2090_v28 }
 0x146   : > { %v1106_v34 = vmax.f32 %v1086_v30, 0.0 }
 0x14b   : > { %v1087_v32 = vpop.f32.mrf.mxu2 }
 0x14c   : > { %v1088_v51 = vadd.f32 %v1087_v32, %v1055_v40  ;;  %v2084_v40 = vld [vmem:[%s2807_s5 + $0x28] sm:$0xff] }
 0x14d   : > { %1303 = vmatpush.bf16.msra.mxu0 %v2084_v40 }
 0x14e   : > { %v1107_v35 = vmax.f32 %v1088_v51, 0.0 }
 0x150   : > { %v1114_v36 = vpack.c.bf16 %v1107_v35, %v1106_v34  ;;  %v2089_v34 = vld [vmem:[%s2809_s7 + $0x10] sm:$0xff] }
 0x151   : > { %1304 = vmatpush.bf16.msra.mxu0 %v2083_v48  ;;  %1421 = vmatpush.bf16.msra.mxu1 %v2089_v34 }
 0x152   : > { %1199 = vmatmul.bf16.gmra.mxu3 %v1114_v36  ;;  %v2088_v36 = vld [vmem:[%s2809_s7 + $0x8] sm:$0xff] }
 0x153   : > { %v1090_v37 = vpop.f32.mrf.mxu2 }
 0x154   : > { %v1091_v38 = vadd.f32 %v1090_v37, %v1058_v52 }
 0x155   : > { %1305 = vmatpush.bf16.msra.mxu0 %v2082_v53  ;;  %1422 = vmatpush.bf16.msra.mxu1 %v2088_v36 }
 0x156   : > { %v1108_v31 = vmax.f32 %v1091_v38, 0.0 }
 0x159   : > { %1306 = vmatpush.bf16.msra.mxu0 %v2081_v16 }
 0x15b   : > { %v1092_v39 = vpop.f32.mrf.mxu2 }
 0x15c   : > { %v1093_v7 = vadd.f32 %v1092_v39, %v1060_v22  ;;  %v2079_v22 = vld [vmem:[%s2807_s5] sm:$0xff] }
 0x15d   : > { %1307 = vmatpush.bf16.msra.mxu0 %v2080_v56 }
 0x15e   : > { %v1109_v42 = vmax.f32 %v1093_v7, 0.0 }
 0x160   : > { %v1115_v19 = vpack.c.bf16 %v1109_v42, %v1108_v31  ;;  %v2087_v31 = vld [vmem:[%s2809_s7] sm:$0xff] }
 0x161   : > { %1308 = vmatpush.bf16.msra.mxu0 %v2079_v22  ;;  %1423 = vmatpush.bf16.msra.mxu1 %v2087_v31 }
 0x162   : > { %1204 = vmatmul.bf16.gmra.mxu3 %v1115_v19  ;;  %v2205_v19 = vld [vmem:[%s2808_s6] ss:$0 sm:$0xff] }
 0x163   : > { %v1095_v45 = vpop.f32.mrf.mxu2 }
 0x164   : > { %v1096_v46 = vadd.f32 %v1095_v45, %v1063_v2 }
 0x166   : > { %v1110_v49 = vmax.f32 %v1096_v46, 0.0 }
 0x16b   : > { %v1097_v47 = vpop.f32.mrf.mxu2 }
 0x16c   : > { %v1098_v41 = vadd.f32 %v1097_v47, %v1065_v10 }
 0x16e   : > { %v1111_v50 = vmax.f32 %v1098_v41, 0.0 }
 0x170   : > { %v1116_v52 = vpack.c.bf16 %v1111_v50, %v1110_v49 }
 0x172   : > { %1209 = vmatmul.bf16.gmra.mxu3 %v1116_v52 }
 0x173   : > { %v1100_v54 = vpop.f32.mrf.mxu2 }
 0x174   : > { %v1101_v55 = vadd.f32 %v1100_v54, %v1068_v14 }
 0x176   : > { %v1112_v58 = vmax.f32 %v1101_v55, 0.0 }
 0x178   : > { %v1117_v8 = vpack.c.bf16 %v1112_v58, %v1112_v58 }
 0x17b   : > { %v1102_v57 = vpop.f32.mrf.mxu2 }
 0x182   : > { %1214 = vmatmul.bf16.gmra.mxu3 %v1117_v8 }
 0x1c5   : > { %v1195_v59 = vpop.f32.mrf.mxu3 }
 0x1c6   : > { %v1196_v61 = vadd.f32 %v2204_v60, %v1195_v59 }
 0x1c8   : > { %v1219_v63 = vmax.f32 %v1196_v61, 0.0 }
 0x1cd   : > { %v1197_v62 = vpop.f32.mrf.mxu3 }
 0x1ce   : > { %v1198_v23 = vadd.f32 %v2204_v60, %v1197_v62 }
 0x1d0   : > { %v1220_v0 = vmax.f32 %v1198_v23, 0.0 }
 0x1d2   : > { %v1228_v1 = vpack.c.bf16 %v1220_v0, %v1219_v63 }
 0x1d4   : > { %1309 = vmatmul.bf16.vlgmr.msra.gmra.mxu0 %v1228_v1 }
 0x1d5   : > { %v1200_v2 = vpop.f32.mrf.mxu3 }
 0x1d6   : > { %v1201_v3 = vadd.f32 %v2204_v60, %v1200_v2 }
 0x1d8   : > { %v1221_v6 = vmax.f32 %v1201_v3, 0.0 }
 0x1dd   : > { %v1202_v4 = vpop.f32.mrf.mxu3 }
 0x1de   : > { %v1203_v5 = vadd.f32 %v2204_v60, %v1202_v4 }
 0x1e0   : > { %v1222_v9 = vmax.f32 %v1203_v5, 0.0 }
 0x1e2   : > { %v1229_v10 = vpack.c.bf16 %v1222_v9, %v1221_v6  ;;  %v2206_v6 = vld [vmem:[%s2810_s8] ss:$0 sm:$0xff] }
 0x1e4   : > { %1314 = vmatmul.bf16.gmra.mxu0 %v1229_v10 }
 0x1e5   : > { %v1205_v11 = vpop.f32.mrf.mxu3 }
 0x1e6   : > { %v1206_v12 = vadd.f32 %v2204_v60, %v1205_v11 }
 0x1e8   : > { %v1223_v14 = vmax.f32 %v1206_v12, 0.0 }
 0x1ed   : > { %v1207_v33 = vpop.f32.mrf.mxu3 }
 0x1ee   : > { %v1208_v15 = vadd.f32 %v2204_v60, %v1207_v33 }
 0x1f0   : > { %v1224_v17 = vmax.f32 %v1208_v15, 0.0 }
 0x1f2   : > { %v1230_v18 = vpack.c.bf16 %v1224_v17, %v1223_v14 }
 0x1f4   : > { %1319 = vmatmul.bf16.gmra.mxu0 %v1230_v18 }
 0x1f5   : > { %v1210_v21 = vpop.f32.mrf.mxu3 }
 0x1f6   : > { %v1211_v27 = vadd.f32 %v2204_v60, %v1210_v21 }
 0x1f8   : > { %v1225_v30 = vmax.f32 %v1211_v27, 0.0 }
 0x1fd   : > { %v1212_v44 = vpop.f32.mrf.mxu3 }
 0x1fe   : > { %v1213_v24 = vadd.f32 %v2204_v60, %v1212_v44 }
 0x200   : > { %v1226_v32 = vmax.f32 %v1213_v24, 0.0 }
 0x202   : > { %v1231_v51 = vpack.c.bf16 %v1226_v32, %v1225_v30 }
 0x204   : > { %1324 = vmatmul.bf16.gmra.mxu0 %v1231_v51 }
 0x205   : > { %v1215_v35 = vpop.f32.mrf.mxu3 }
 0x206   : > { %v1216_v37 = vadd.f32 %v2204_v60, %v1215_v35 }
 0x208   : > { %v1227_v39 = vmax.f32 %v1216_v37, 0.0 }
 0x20a   : > { %v1232_v7 = vpack.c.bf16 %v1227_v39, %v1227_v39 }
 0x20d   : > { %v1217_v38 = vpop.f32.mrf.mxu3 }
 0x214   : > { %1329 = vmatmul.bf16.gmra.mxu0 %v1232_v7 }
 0x251   : > { %v1310_v42 = vpop.f32.mrf.mxu0 }
 0x252   : > { %v1311_v43 = vadd.f32 %v2205_v19, %v1310_v42 }
 0x254   : > { %v1334_v40 = vmax.f32 %v1311_v43, 0.0 }
 0x259   : > { %v1312_v45 = vpop.f32.mrf.mxu0 }
 0x25a   : > { %v1313_v29 = vadd.f32 %v2205_v19, %v1312_v45 }
 0x25c   : > { %v1335_v46 = vmax.f32 %v1313_v29, 0.0 }
 0x25e   : > { %v1343_v47 = vpack.c.bf16 %v1335_v46, %v1334_v40 }
 0x260   : > { %1424 = vmatmul.bf16.vlgmr.msra.gmra.mxu1 %v1343_v47 }
 0x261   : > { %v1315_v41 = vpop.f32.mrf.mxu0 }
 0x262   : > { %v1316_v48 = vadd.f32 %v2205_v19, %v1315_v41 }
 0x264   : > { %v1336_v52 = vmax.f32 %v1316_v48, 0.0 }
 0x269   : > { %v1317_v49 = vpop.f32.mrf.mxu0 }
 0x26a   : > { %v1318_v50 = vadd.f32 %v2205_v19, %v1317_v49 }
 0x26c   : > { %v1337_v53 = vmax.f32 %v1318_v50, 0.0 }
 0x26e   : > { %v1344_v54 = vpack.c.bf16 %v1337_v53, %v1336_v52 }
 0x270   : > { %1429 = vmatmul.bf16.gmra.mxu1 %v1344_v54 }
 0x271   : > { %v1320_v16 = vpop.f32.mrf.mxu0 }
 0x272   : > { %v1321_v55 = vadd.f32 %v2205_v19, %v1320_v16 }
 0x274   : > { %v1338_v58 = vmax.f32 %v1321_v55, 0.0 }
 0x279   : > { %v1322_v56 = vpop.f32.mrf.mxu0 }
 0x27a   : > { %v1323_v57 = vadd.f32 %v2205_v19, %v1322_v56 }
 0x27c   : > { %v1339_v8 = vmax.f32 %v1323_v57, 0.0 }
 0x27e   : > { %v1345_v22 = vpack.c.bf16 %v1339_v8, %v1338_v58 }
 0x280   : > { %1434 = vmatmul.bf16.gmra.mxu1 %v1345_v22 }
 0x281   : > { %v1325_v59 = vpop.f32.mrf.mxu0 }
 0x282   : > { %v1326_v60 = vadd.f32 %v2205_v19, %v1325_v59 }
 0x284   : > { %v1340_v23 = vmax.f32 %v1326_v60, 0.0 }
 0x289   : > { %v1327_v61 = vpop.f32.mrf.mxu0 }
 0x28a   : > { %v1328_v62 = vadd.f32 %v2205_v19, %v1327_v61 }
 0x28c   : > { %v1341_v63 = vmax.f32 %v1328_v62, 0.0 }
 0x28e   : > { %v1346_v0 = vpack.c.bf16 %v1341_v63, %v1340_v23 }
 0x290   : > { %1439 = vmatmul.bf16.gmra.mxu1 %v1346_v0 }
 0x291   : > { %v1330_v1 = vpop.f32.mrf.mxu0 }
 0x292   : > { %v1331_v2 = vadd.f32 %v2205_v19, %v1330_v1 }
 0x294   : > { %v1342_v4 = vmax.f32 %v1331_v2, 0.0 }
 0x296   : > { %v1347_v5 = vpack.c.bf16 %v1342_v4, %v1342_v4 }
 0x299   : > { %v1332_v3 = vpop.f32.mrf.mxu0 }
 0x2a0   : > { %1444 = vmatmul.bf16.gmra.mxu1 %v1347_v5 }
 0x2dd   : > { %v1425_v9 = vpop.f32.mrf.mxu1 }
 0x2de   : > { %v1426_v10 = vadd.f32 %v2206_v6, %v1425_v9 }
 0x2e0   : > { %1449 = vst [vmem:[%s2728_s14] sm:$0xff] %v1426_v10 }
 0x2e5   : > { %v1427_v11 = vpop.f32.mrf.mxu1 }
 0x2e6   : > { %v1428_v12 = vadd.f32 %v2206_v6, %v1427_v11 }
 0x2e8   : > { %1450 = vst [vmem:[%s2728_s14 + $0x8] sm:$0xff] %v1428_v12 }
 0x2ed   : > { %v1430_v33 = vpop.f32.mrf.mxu1 }
 0x2ee   : > { %v1431_v13 = vadd.f32 %v2206_v6, %v1430_v33 }
 0x2f0   : > { %1451 = vst [vmem:[%s2728_s14 + $0x10] sm:$0xff] %v1431_v13 }
 0x2f5   : > { %v1432_v15 = vpop.f32.mrf.mxu1 }
 0x2f6   : > { %v1433_v14 = vadd.f32 %v2206_v6, %v1432_v15 }
 0x2f8   : > { %1452 = vst [vmem:[%s2728_s14 + $0x18] sm:$0xff] %v1433_v14 }
 0x2fd   : > { %v1435_v17 = vpop.f32.mrf.mxu1 }
 0x2fe   : > { %v1436_v18 = vadd.f32 %v2206_v6, %v1435_v17 }
 0x300   : > { %1453 = vst [vmem:[%s2728_s14 + $0x20] sm:$0xff] %v1436_v18 }
 0x305   : > { %v1437_v20 = vpop.f32.mrf.mxu1 }
 0x306   : > { %v1438_v21 = vadd.f32 %v2206_v6, %v1437_v20 }
 0x308   : > { %1454 = vst [vmem:[%s2728_s14 + $0x28] sm:$0xff] %v1438_v21 }
 0x30d   : > { %v1440_v25 = vpop.f32.mrf.mxu1 }
 0x30e   : > { %v1441_v26 = vadd.f32 %v2206_v6, %v1440_v25 }
 0x310   : > { %1455 = vst [vmem:[%s2728_s14 + $0x30] sm:$0xff] %v1441_v26 }
 0x315   : > { %v1442_v27 = vpop.f32.mrf.mxu1 }
 0x316   : > { %v1443_v44 = vadd.f32 %v2206_v6, %v1442_v27 }
 0x318   : > { %1456 = vst [vmem:[%s2728_s14 + $0x38] sm:$0xff] %v1443_v44 }
 0x31d   : > { %v1445_v24 = vpop.f32.mrf.mxu1 }
 0x31e   : > { %v1446_v28 = vadd.f32 %v2206_v6, %v1445_v24 }
 0x320   : > { %1457 = vst [vmem:[%s2728_s14 + $0x40] sm:$0xff] %v1446_v28 }
 0x321   : > { %1464 = sbr.rel (!%p2376_p4) target bundleno = 862 (0x35e), region = 60 }
 0x325   : > { %v1447_v30 = vpop.f32.mrf.mxu1 }
 0x326   : > { %s2821_s30 = smov (!%p1467_p8, %s1466_s30), 9 }
 0x327   : > { %s2010_s21 = sshll.u32 %s2821_s30, 3 }
 0x328   : > { %p2013_p9 = scmp.eq.s32.totalorder %s2010_s21, 0 }
 0x329   : > { %2207 = sdivrem.u32 (!%p2013_p9), %s2821_s30, 9 }
 0x32a   : > { %1475 = sbr.rel (%p2013_p9) target bundleno = 862 (0x35e), region = 64 }
 0x332   : > { %s2752_s17 = spop.drf %2207 }
 0x333   : > { %s2209_s23 = spop.drf %2207  ;;  %p2014_p10 = scmp.le.s32.totalorder %s2752_s17, 0 }
 0x334   : > { %s2813_s12 = smov (!%p2014_p10), %s2746_s20  ;;  %s2814_s11 = smov (!%p2014_p10), %s2728_s14 }
 0x335   : > { %1664 = sbr.rel (%p2014_p10) target bundleno = 836 (0x344), region = 140  ;;  %s2761_s24 = smov (!%p2014_p10), 0  }
 0x336   : > { %s2763_s22 = smov (!%p2014_p10), 0  }
 0x33a LB: >> { %v1556_v32 = vld [vmem:[%s2275_s11] sm:$0xff]  ;;  %v1558_v51 = vld [vmem:[%s2275_s11 + $0x8] sm:$0xff]  ;;  %v1560_v34 = vld [vmem:[%s2275_s11 + $0x10] sm:$0xff]  ;;  %s1574_s25 = sadd.s32 1, %s2279_s24  ;;  %s1550_s22 = sadd.s32 1, %s2283_s22   ;;  %s2283_s22 = sphi %s2763_s22, %s1550_s22   ;;  %s2279_s24 = sphi %s2761_s24, %s2816_s24   ;;  %s2275_s11 = sphi %s2814_s11, %s1579_s11   ;;  %s2271_s12 = sphi %s2813_s12, %s2815_s12  }
 0x33b   : >> { %1557 = vst [vmem:[%s2271_s12] sm:$0xff] %v1556_v32  ;;  %v1562_v35 = vld [vmem:[%s2275_s11 + $0x18] sm:$0xff]  ;;  %p1575_p11 = scmp.ge.s32.totalorder %s1574_s25, %s2752_s17  ;;  %v1564_v36 = vld [vmem:[%s2275_s11 + $0x20] sm:$0xff]  ;;  %v1566_v37 = vld [vmem:[%s2275_s11 + $0x28] sm:$0xff]  ;;  %p1549_p12 = scmp.ge.s32.totalorder %s1550_s22, %s2752_s17 }
 0x33c   : >> { %1559 = vst [vmem:[%s2271_s12 + $0x8] sm:$0xff] %v1558_v51  ;;  %v1568_v38 = vld [vmem:[%s2275_s11 + $0x30] sm:$0xff]  ;;  %v1570_v39 = vld [vmem:[%s2275_s11 + $0x38] sm:$0xff]  ;;  %v1572_v7 = vld [vmem:[%s2275_s11 + $0x40] sm:$0xff] }
 0x33d   : >> { %1561 = vst [vmem:[%s2271_s12 + $0x10] sm:$0xff] %v1560_v34  ;;  %s2823_s25 = smov (%p1575_p11, %s1574_s25), 0 }
 0x33e   : >> { %1563 = vst [vmem:[%s2271_s12 + $0x18] sm:$0xff] %v1562_v35  ;;  %s1577_s26 = smul.u32 72, %s2823_s25  ;;  %s2816_s24 = smov %s2823_s25 }
 0x33f   : >> { %1565 = vst [vmem:[%s2271_s12 + $0x20] sm:$0xff] %v1564_v36  ;;  %1552 = sbr.rel (!%p1549_p12) target bundleno = 826 (0x33a), region = 146 }
 0x340   : >> { %1567 = vst [vmem:[%s2271_s12 + $0x28] sm:$0xff] %v1566_v37  ;;  %s1579_s11 = scalar_lea.vmem %s2728_s14, %s1577_s26 [#allocation2]   ;;  %s1580_s27 = scalar_lea.vmem %s2746_s20, %s1577_s26  }
 0x341   : >> { %1569 = vst [vmem:[%s2271_s12 + $0x30] sm:$0xff] %v1568_v38 }
 0x342   : >> { %1571 = vst [vmem:[%s2271_s12 + $0x38] sm:$0xff] %v1570_v39 }
 0x343   : >> { %1573 = vst [vmem:[%s2271_s12 + $0x40] sm:$0xff] %v1572_v7  ;;  %s2815_s12 = smov %s1580_s27 }
 0x344 PF: > { %2210 = sdivrem.u32 %s2821_s30, 9 }
 0x345   : > { %s2015_s28 = smul.u32 72, %s2752_s17 }
 0x347   : > { %s2787_s29 = scalar_lea.vmem %s2728_s14, %s2015_s28 [#allocation2]   ;;  %s1587_s15 = scalar_lea.vmem %s2746_s20, %s2015_s28  }
 0x34d   : > { %s2211_s18 = spop.drf %2210 }
 0x34e   : > { %s2212_s19 = spop.drf %2210 }
 0x34f   : > { %p2017_p13 = scmp.le.s32.totalorder %s2212_s19, 0 }
 0x350   : > { %s2285_s21 = smov (!%p2017_p13), %s1587_s15   ;;  %s2289_s23 = smov (!%p2017_p13), %s2787_s29  }
 0x351   : > { %1678 = sbr.rel (%p2017_p13) target bundleno = 862 (0x35e), region = 151  ;;  %s2293_s25 = smov (!%p2017_p13), 0  }
 0x352   : > { %s2297_s22 = smov (!%p2017_p13), 0  }
 0x356 LB: >> { %v1597_v31 = vld [vmem:[%s2291_s23] sm:$0xff]  ;;  %s1599_s14 = sadd.s32 1, %s2295_s25  ;;  %s1591_s22 = sadd.s32 1, %s2299_s22   ;;  %s2299_s22 = sphi %s2297_s22, %s1591_s22   ;;  %s2295_s25 = sphi %s2293_s25, %s2294_s25   ;;  %s2291_s23 = sphi %s2289_s23, %s1604_s23   ;;  %s2287_s21 = sphi %s2285_s21, %s1605_s21  }
 0x357   : >> { %1598 = vst [vmem:[%s2287_s21] sm:$0xff] %v1597_v31  ;;  %p1600_p0 = scmp.ge.s32.totalorder %s1599_s14, %s2212_s19  ;;  %p1590_p1 = scmp.ge.s32.totalorder %s1591_s22, %s2212_s19 }
 0x359   : >> { %s2825_s14 = smov (%p1600_p0, %s1599_s14), 0  ;;  %1593 = sbr.rel (!%p1590_p1) target bundleno = 854 (0x356), region = 157 }
 0x35a   : >> { %s2018_s30 = sshll.u32 %s2825_s14, 3  ;;  %s2294_s25 = smov %s2825_s14  }
 0x35b   : >> { %s1604_s23 = scalar_lea.vmem %s2787_s29, %s2018_s30 [#allocation2]   ;;  %s1605_s21 = scalar_lea.vmem %s1587_s15, %s2018_s30  }
 0x35e PF: > { %p16_p2 = scmp.ge.s32.totalorder %s2366_s13, 6   ;;  %s2817_s30 = smov %s2263_s10 }
 0x35f   : > { %s2818_s10 = smov %s2374_s16  ;;  %s2819_s11 = smov %s2366_s13 }
 0x360   :  { %18 = sbr.rel (!%p16_p2) target bundleno = 2 (0x2), region = 168 }

</bundles_post_ra>
